<compile_context>
chip_gen: v6e
topology: v6e:2x2x1
jax: 0.10.0
libtpu: 0.0.40
codegen_flags: <defaults>
</compile_context>

<pallas_src>
import functools

import jax
import jax.numpy as jnp
from jax.experimental import pallas as pl
from jax.experimental.pallas import tpu as pltpu


# -----------------------------------------------------------------------------
# Pallas kernel: one bidirectional LSTM layer, grid over time.
# -----------------------------------------------------------------------------
def _bilstm_kernel(*refs, nsteps, hdim, last):
    """Fused forward+backward LSTM step for one grid index t.

    Forward direction processes time t; backward direction processes time
    T-1-t (its gates / output blocks are selected by a reversed index_map).
    h/c live in VMEM scratch and persist across the time grid.
    """
    if last:
        (len_ref, gf_ref, gb_ref, whh_f_ref, whh_b_ref,
         fc_w_ref, fc_b_ref, preds_ref, h_f, c_f, h_b, c_b) = refs
    else:
        (len_ref, gf_ref, gb_ref, whh_f_ref, whh_b_ref,
         yf_ref, yb_ref, h_f, c_f, h_b, c_b) = refs

    H = hdim
    t = pl.program_id(0)
    tb = (nsteps - 1) - t            # time index the backward direction sees

    @pl.when(t == 0)
    def _init():
        h_f[...] = jnp.zeros_like(h_f)
        c_f[...] = jnp.zeros_like(c_f)
        h_b[...] = jnp.zeros_like(h_b)
        c_b[...] = jnp.zeros_like(c_b)

    lens = len_ref[...]              # (B, 1) int32
    mask_f = t < lens                # (B, 1) bool
    mask_b = tb < lens

    def cell(g_pre, h_ref, c_ref, whh_ref):
        # z = precomputed (x@W_ih + b) + h @ W_hh   -> (B, 4H), lane-dense
        z = (g_pre.astype(jnp.float32)
             + jnp.dot(h_ref[...].astype(jnp.bfloat16), whh_ref[...],
                       preferred_element_type=jnp.float32))
        # Full-width transcendentals (2 EUP ops), slice afterwards.
        zs = jax.nn.sigmoid(z)
        zt = jnp.tanh(z)
        i = zs[:, 0:H]
        f = zs[:, H:2 * H]
        g = zt[:, 2 * H:3 * H]
        o = zs[:, 3 * H:4 * H]
        c_new = f * c_ref[...] + i * g
        h_new = o * jnp.tanh(c_new)
        return h_new, c_new

    hf_new, cf_new = cell(gf_ref[0], h_f, c_f, whh_f_ref)
    hb_new, cb_new = cell(gb_ref[0], h_b, c_b, whh_b_ref)

    # Freeze state past each sequence's valid length (packed-sequence semantics).
    hf_upd = jnp.where(mask_f, hf_new, h_f[...])
    cf_upd = jnp.where(mask_f, cf_new, c_f[...])
    hb_upd = jnp.where(mask_b, hb_new, h_b[...])
    cb_upd = jnp.where(mask_b, cb_new, c_b[...])

    h_f[...] = hf_upd
    c_f[...] = cf_upd
    h_b[...] = hb_upd
    c_b[...] = cb_upd

    if not last:
        # Per-step outputs (zero past length).  yb's BlockSpec maps to time tb,
        # so yb ends up in natural time order.
        yf_ref[0] = jnp.where(mask_f, hf_upd, 0.0).astype(yf_ref.dtype)
        yb_ref[0] = jnp.where(mask_b, hb_upd, 0.0).astype(yb_ref.dtype)
    else:
        # Classifier folded into the epilogue of the last layer.
        @pl.when(t == nsteps - 1)
        def _finalize():
            # torch: cat([hidden[-1], hidden[-2]]) == [backward_last, forward_last]
            hidden = jnp.concatenate([hb_upd, hf_upd], axis=-1)   # (B, 2H) f32
            preds_ref[...] = (jnp.dot(hidden, fc_w_ref[...],
                                      preferred_element_type=jnp.float32)
                              + fc_b_ref[...])


# -----------------------------------------------------------------------------
# Wrappers
# -----------------------------------------------------------------------------
def bilstm_layer(len2d, gates_f, gates_b, w_hh_f, w_hh_b, fc=None):
    """One fused bidirectional layer.

    len2d   : (B, 1) int32
    gates_f : (T, B, 4H) bf16   precomputed x@W_ih_f + b_f
    gates_b : (T, B, 4H) bf16   precomputed x@W_ih_b + b_b
    w_hh_*  : (H, 4H) f32 (cast to bf16 here)
    fc      : None -> returns (y_f, y_b) each (T, B, H) bf16
              (fc_w, fc_b) -> returns preds (B, C) f32
    """
    T, Bp, G = gates_f.shape
    H = w_hh_f.shape[0]

    const2 = lambda t: (0, 0)
    stream = lambda t: (t, 0, 0)
    stream_rev = lambda t: (T - 1 - t, 0, 0)

    in_specs = [
        pl.BlockSpec((Bp, 1), const2),                 # lengths, resident
        pl.BlockSpec((1, Bp, G), stream),              # forward gates, streamed
        pl.BlockSpec((1, Bp, G), stream_rev),          # backward gates, streamed
        pl.BlockSpec((H, G), const2),                  # W_hh fwd, resident
        pl.BlockSpec((H, G), const2),                  # W_hh bwd, resident
    ]
    scratch = [pltpu.VMEM((Bp, H), jnp.float32) for _ in range(4)]  # h_f,c_f,h_b,c_b
    args = [len2d, gates_f, gates_b,
            w_hh_f.astype(jnp.bfloat16), w_hh_b.astype(jnp.bfloat16)]

    if fc is None:
        kern = functools.partial(_bilstm_kernel, nsteps=T, hdim=H, last=False)
        out_shape = (jax.ShapeDtypeStruct((T, Bp, H), jnp.bfloat16),
                     jax.ShapeDtypeStruct((T, Bp, H), jnp.bfloat16))
        out_specs = (pl.BlockSpec((1, Bp, H), stream),
                     pl.BlockSpec((1, Bp, H), stream_rev))
    else:
        fc_w, fc_b = fc
        C = fc_w.shape[1]
        in_specs += [pl.BlockSpec((2 * H, C), const2),
                     pl.BlockSpec((1, C), const2)]
        args += [fc_w, fc_b]
        kern = functools.partial(_bilstm_kernel, nsteps=T, hdim=H, last=True)
        out_shape = jax.ShapeDtypeStruct((Bp, C), jnp.float32)
        out_specs = pl.BlockSpec((Bp, C), const2)

    return pl.pallas_call(
        kern,
        grid=(T,),
        out_shape=out_shape,
        in_specs=in_specs,
        out_specs=out_specs,
        scratch_shapes=scratch,
        compiler_params=pltpu.CompilerParams(
            dimension_semantics=("arbitrary",)),       # serial carry over time
    )(*args)


def _gates_first(emb_btE, w_ih, bias):
    """Layer-0 gate precompute.  emb: (B, T, E); output time-major (T, B, 4H) bf16.
    The B,T->T,B layout change is done by the einsum (no materialized transpose)."""
    z = jnp.einsum('btd,dg->tbg', emb_btE.astype(jnp.bfloat16),
                   w_ih.astype(jnp.bfloat16),
                   preferred_element_type=jnp.float32)
    return (z + bias).astype(jnp.bfloat16)


def _gates_next(y_f, y_b, w_ih, bias, H):
    """Layer>0 gate precompute from the two direction outputs (no concat copy)."""
    w = w_ih.astype(jnp.bfloat16)
    z = (jnp.einsum('tbh,hg->tbg', y_f, w[:H],
                    preferred_element_type=jnp.float32)
         + jnp.einsum('tbh,hg->tbg', y_b, w[H:],
                      preferred_element_type=jnp.float32))
    return (z + bias).astype(jnp.bfloat16)


def lstm_classifier_forward(params, tokens, lengths):
    """tokens: (B, T) int32, lengths: (B,) int32 -> (B, num_classes) f32."""
    B0, T = tokens.shape
    Bp = ((B0 + 7) // 8) * 8                  # pad batch to sublane multiple
    pad_b = Bp - B0
    tokens_p = jnp.pad(tokens, ((0, pad_b), (0, 0)))       # dummy rows, len 0
    lengths_p = jnp.pad(lengths.astype(jnp.int32), (0, pad_b)).reshape(Bp, 1)

    # Embedding lookup (pad row of the table is zero).  Dropout = identity.
    emb = jnp.take(params["embedding"], tokens_p, axis=0)  # (Bp, T, E) f32

    num_layers = len(params["lstm"])
    y_f = y_b = None
    preds = None
    for li, lp in enumerate(params["lstm"]):
        w_ih_f, w_hh_f, b_f = lp["fwd"]
        w_ih_b, w_hh_b, b_b = lp["bwd"]
        H = w_hh_f.shape[0]
        if li == 0:
            gf = _gates_first(emb, w_ih_f, b_f)
            gb = _gates_first(emb, w_ih_b, b_b)
        else:
            gf = _gates_next(y_f, y_b, w_ih_f, b_f, H)
            gb = _gates_next(y_f, y_b, w_ih_b, b_b, H)

        if li < num_layers - 1:
            y_f, y_b = bilstm_layer(lengths_p, gf, gb, w_hh_f, w_hh_b)
        else:
            preds = bilstm_layer(lengths_p, gf, gb, w_hh_f, w_hh_b,
                                 fc=(params["fc_w_t"], params["fc_b"]))
    return preds[:B0]


# -----------------------------------------------------------------------------
# Deterministic parameter construction
# -----------------------------------------------------------------------------
def init_params(key, vocab_size, embed_dim, hidden_dim, num_layers,
                num_classes, pad_index):
    n_draws = 1 + num_layers * 2 * 4 + 2
    keys = iter(jax.random.split(key, n_draws))
    k = 1.0 / jnp.sqrt(hidden_dim)

    def u(shape):
        return jax.random.uniform(next(keys), shape, minval=-k, maxval=k,
                                  dtype=jnp.float32)

    emb = u((vocab_size, embed_dim)).at[pad_index].set(0.0)   # padding row = 0

    layers = []
    for layer in range(num_layers):
        din = embed_dim if layer == 0 else 2 * hidden_dim
        lp = {}
        for d in ("fwd", "bwd"):
            w_ih_t = u((din, 4 * hidden_dim))                 # (Din, 4H)
            w_hh_t = u((hidden_dim, 4 * hidden_dim))          # (H, 4H)
            bias = u((1, 4 * hidden_dim)) + u((1, 4 * hidden_dim))  # b_ih + b_hh
            lp[d] = (w_ih_t, w_hh_t, bias)
        layers.append(lp)

    fc_w_t = u((2 * hidden_dim, num_classes))
    fc_b = u((1, num_classes))
    return {"embedding": emb, "lstm": layers, "fc_w_t": fc_w_t, "fc_b": fc_b}


# -----------------------------------------------------------------------------
if __name__ == "__main__":
    vocab_size = 50
    embed_dim = 32
    num_classes = 4
    pad_index = 0
    hidden_dim = 32
    num_layers = 2
    B, T = 2, 8

    key = jax.random.PRNGKey(0)
    k_param, k_tok = jax.random.split(key)

    params = init_params(k_param, vocab_size, embed_dim, hidden_dim,
                         num_layers, num_classes, pad_index)

    lengths = jnp.array([8, 5], dtype=jnp.int32)
    tokens = jax.random.randint(k_tok, (B, T), 1, vocab_size, dtype=jnp.int32)
    valid = jnp.arange(T)[None, :] < lengths[:, None]
    tokens = jnp.where(valid, tokens, pad_index)

    fwd = jax.jit(functools.partial(lstm_classifier_forward, params))
    preds = fwd(tokens, lengths)
    jax.block_until_ready(preds)
    assert preds.shape == (B, num_classes)
    print("KERNEL_OK")
</pallas_src>

<mosaic_0001>
module attributes {stable_mosaic.version = 11 : i64} {
  func.func @_bilstm_kernel(%arg0: i32, %arg1: memref<8x1xi32, #tpu.memory_space<vmem>>, %arg2: memref<1x8x128xbf16, #tpu.memory_space<vmem>>, %arg3: memref<1x8x128xbf16, #tpu.memory_space<vmem>>, %arg4: memref<32x128xbf16, #tpu.memory_space<vmem>>, %arg5: memref<32x128xbf16, #tpu.memory_space<vmem>>, %arg6: memref<64x4xf32, #tpu.memory_space<vmem>>, %arg7: memref<1x4xf32, #tpu.memory_space<vmem>>, %arg8: memref<8x4xf32, #tpu.memory_space<vmem>>, %arg9: memref<8x32xf32, #tpu.memory_space<vmem>>, %arg10: memref<8x32xf32, #tpu.memory_space<vmem>>, %arg11: memref<8x32xf32, #tpu.memory_space<vmem>>, %arg12: memref<8x32xf32, #tpu.memory_space<vmem>>) attributes {dimension_semantics = [#tpu.dimension_semantics<arbitrary>], iteration_bounds = array<i64: 8>, scalar_prefetch = 0 : i64, scratch_operands = 4 : i64, tpu.core_type = #tpu.core_type<tc>, window_params = [{pipeline_mode = #tpu.pipeline_mode<synchronous>, transform_indices = @transform_0, window_bounds = array<i64: 8, 1>}, {transform_indices = @transform_1, window_bounds = array<i64: 1, 8, 128>}, {transform_indices = @transform_2, window_bounds = array<i64: 1, 8, 128>}, {pipeline_mode = #tpu.pipeline_mode<synchronous>, transform_indices = @transform_3, window_bounds = array<i64: 32, 128>}, {pipeline_mode = #tpu.pipeline_mode<synchronous>, transform_indices = @transform_4, window_bounds = array<i64: 32, 128>}, {pipeline_mode = #tpu.pipeline_mode<synchronous>, transform_indices = @transform_5, window_bounds = array<i64: 64, 4>}, {pipeline_mode = #tpu.pipeline_mode<synchronous>, transform_indices = @transform_6, window_bounds = array<i64: 1, 4>}, {pipeline_mode = #tpu.pipeline_mode<synchronous>, transform_indices = @transform_7, window_bounds = array<i64: 8, 4>}]} {
    %c7_i32 = arith.constant 7 : i32
    %0 = arith.subi %c7_i32, %arg0 : i32
    %c0_i32 = arith.constant 0 : i32
    %1 = arith.cmpi eq, %arg0, %c0_i32 : i32
    %2 = arith.extui %1 : i1 to i32
    %c0_i32_0 = arith.constant 0 : i32
    %3 = arith.cmpi ne, %2, %c0_i32_0 : i32
    scf.if %3 {
      %cst_41 = arith.constant 0.000000e+00 : f32
      %80 = vector.broadcast %cst_41 : f32 to vector<8x32xf32>
      %c0_42 = arith.constant 0 : index
      %c0_43 = arith.constant 0 : index
      %81 = vector.load %arg9[%c0_42, %c0_43] : memref<8x32xf32, #tpu.memory_space<vmem>>, vector<8x32xf32>
      tpu.vector_store %arg9[%c0_42, %c0_43], %80 {strides = array<i32>} : memref<8x32xf32, #tpu.memory_space<vmem>>, vector<8x32xf32>,
      %cst_44 = arith.constant 0.000000e+00 : f32
      %82 = vector.broadcast %cst_44 : f32 to vector<8x32xf32>
      %c0_45 = arith.constant 0 : index
      %c0_46 = arith.constant 0 : index
      %83 = vector.load %arg10[%c0_45, %c0_46] : memref<8x32xf32, #tpu.memory_space<vmem>>, vector<8x32xf32>
      tpu.vector_store %arg10[%c0_45, %c0_46], %82 {strides = array<i32>} : memref<8x32xf32, #tpu.memory_space<vmem>>, vector<8x32xf32>,
      %cst_47 = arith.constant 0.000000e+00 : f32
      %84 = vector.broadcast %cst_47 : f32 to vector<8x32xf32>
      %c0_48 = arith.constant 0 : index
      %c0_49 = arith.constant 0 : index
      %85 = vector.load %arg11[%c0_48, %c0_49] : memref<8x32xf32, #tpu.memory_space<vmem>>, vector<8x32xf32>
      tpu.vector_store %arg11[%c0_48, %c0_49], %84 {strides = array<i32>} : memref<8x32xf32, #tpu.memory_space<vmem>>, vector<8x32xf32>,
      %cst_50 = arith.constant 0.000000e+00 : f32
      %86 = vector.broadcast %cst_50 : f32 to vector<8x32xf32>
      %c0_51 = arith.constant 0 : index
      %c0_52 = arith.constant 0 : index
      %87 = vector.load %arg12[%c0_51, %c0_52] : memref<8x32xf32, #tpu.memory_space<vmem>>, vector<8x32xf32>
      tpu.vector_store %arg12[%c0_51, %c0_52], %86 {strides = array<i32>} : memref<8x32xf32, #tpu.memory_space<vmem>>, vector<8x32xf32>,
    } else {
    }
    %c0 = arith.constant 0 : index
    %c0_1 = arith.constant 0 : index
    %4 = vector.load %arg1[%c0, %c0_1] : memref<8x1xi32, #tpu.memory_space<vmem>>, vector<8x1xi32>
    %5 = vector.broadcast %arg0 : i32 to vector<8x1xi32>
    %6 = arith.cmpi slt, %5, %4 : vector<8x1xi32>
    %7 = vector.broadcast %0 : i32 to vector<8x1xi32>
    %8 = arith.cmpi slt, %7, %4 : vector<8x1xi32>
    %c0_2 = arith.constant 0 : index
    %c0_3 = arith.constant 0 : index
    %c0_4 = arith.constant 0 : index
    %9 = vector.load %arg2[%c0_2, %c0_3, %c0_4] : memref<1x8x128xbf16, #tpu.memory_space<vmem>>, vector<1x8x128xbf16>
    %10 = vector.shape_cast %9 : vector<1x8x128xbf16> to vector<8x128xbf16>
    %11 = arith.extf %10 : vector<8x128xbf16> to vector<8x128xf32>
    %c0_5 = arith.constant 0 : index
    %c0_6 = arith.constant 0 : index
    %12 = vector.load %arg9[%c0_5, %c0_6] : memref<8x32xf32, #tpu.memory_space<vmem>>, vector<8x32xf32>
    %13 = arith.truncf %12 : vector<8x32xf32> to vector<8x32xbf16>
    %c0_7 = arith.constant 0 : index
    %c0_8 = arith.constant 0 : index
    %14 = vector.load %arg4[%c0_7, %c0_8] : memref<32x128xbf16, #tpu.memory_space<vmem>>, vector<32x128xbf16>
    %cst = arith.constant dense<0.000000e+00> : vector<8x128xf32>
    %15 = tpu.matmul %13, %14, %cst {dimension_numbers = #tpu.dot_dimension_numbers<[1], [0], [0], [1], [0, 0, 1, 1], [], []>} : vector<8x32xbf16>, vector<32x128xbf16>, vector<8x128xf32> -> vector<8x128xf32>
    %16 = arith.addf %11, %15 : vector<8x128xf32>
    %17 = arith.negf %16 : vector<8x128xf32>
    %18 = math.exp %17 : vector<8x128xf32>
    %cst_9 = arith.constant 1.000000e+00 : f32
    %19 = vector.broadcast %cst_9 : f32 to vector<8x128xf32>
    %20 = arith.addf %19, %18 : vector<8x128xf32>
    %21 = arith.divf %19, %20 : vector<8x128xf32>
    %22 = math.tanh %16 : vector<8x128xf32>
    %23 = vector.extract_strided_slice %21 {offsets = [0, 0], sizes = [8, 32], strides = [1, 1]} : vector<8x128xf32> to vector<8x32xf32>
    %24 = vector.extract_strided_slice %21 {offsets = [0, 32], sizes = [8, 32], strides = [1, 1]} : vector<8x128xf32> to vector<8x32xf32>
    %25 = vector.extract_strided_slice %22 {offsets = [0, 64], sizes = [8, 32], strides = [1, 1]} : vector<8x128xf32> to vector<8x32xf32>
    %26 = vector.extract_strided_slice %21 {offsets = [0, 96], sizes = [8, 32], strides = [1, 1]} : vector<8x128xf32> to vector<8x32xf32>
    %c0_10 = arith.constant 0 : index
    %c0_11 = arith.constant 0 : index
    %27 = vector.load %arg10[%c0_10, %c0_11] : memref<8x32xf32, #tpu.memory_space<vmem>>, vector<8x32xf32>
    %28 = arith.mulf %24, %27 : vector<8x32xf32>
    %29 = arith.mulf %23, %25 : vector<8x32xf32>
    %30 = arith.addf %28, %29 : vector<8x32xf32>
    %31 = math.tanh %30 : vector<8x32xf32>
    %32 = arith.mulf %26, %31 : vector<8x32xf32>
    %c0_12 = arith.constant 0 : index
    %c0_13 = arith.constant 0 : index
    %c0_14 = arith.constant 0 : index
    %33 = vector.load %arg3[%c0_12, %c0_13, %c0_14] : memref<1x8x128xbf16, #tpu.memory_space<vmem>>, vector<1x8x128xbf16>
    %34 = vector.shape_cast %33 : vector<1x8x128xbf16> to vector<8x128xbf16>
    %35 = arith.extf %34 : vector<8x128xbf16> to vector<8x128xf32>
    %c0_15 = arith.constant 0 : index
    %c0_16 = arith.constant 0 : index
    %36 = vector.load %arg11[%c0_15, %c0_16] : memref<8x32xf32, #tpu.memory_space<vmem>>, vector<8x32xf32>
    %37 = arith.truncf %36 : vector<8x32xf32> to vector<8x32xbf16>
    %c0_17 = arith.constant 0 : index
    %c0_18 = arith.constant 0 : index
    %38 = vector.load %arg5[%c0_17, %c0_18] : memref<32x128xbf16, #tpu.memory_space<vmem>>, vector<32x128xbf16>
    %cst_19 = arith.constant dense<0.000000e+00> : vector<8x128xf32>
    %39 = tpu.matmul %37, %38, %cst_19 {dimension_numbers = #tpu.dot_dimension_numbers<[1], [0], [0], [1], [0, 0, 1, 1], [], []>} : vector<8x32xbf16>, vector<32x128xbf16>, vector<8x128xf32> -> vector<8x128xf32>
    %40 = arith.addf %35, %39 : vector<8x128xf32>
    %41 = arith.negf %40 : vector<8x128xf32>
    %42 = math.exp %41 : vector<8x128xf32>
    %cst_20 = arith.constant 1.000000e+00 : f32
    %43 = vector.broadcast %cst_20 : f32 to vector<8x128xf32>
    %44 = arith.addf %43, %42 : vector<8x128xf32>
    %45 = arith.divf %43, %44 : vector<8x128xf32>
    %46 = math.tanh %40 : vector<8x128xf32>
    %47 = vector.extract_strided_slice %45 {offsets = [0, 0], sizes = [8, 32], strides = [1, 1]} : vector<8x128xf32> to vector<8x32xf32>
    %48 = vector.extract_strided_slice %45 {offsets = [0, 32], sizes = [8, 32], strides = [1, 1]} : vector<8x128xf32> to vector<8x32xf32>
    %49 = vector.extract_strided_slice %46 {offsets = [0, 64], sizes = [8, 32], strides = [1, 1]} : vector<8x128xf32> to vector<8x32xf32>
    %50 = vector.extract_strided_slice %45 {offsets = [0, 96], sizes = [8, 32], strides = [1, 1]} : vector<8x128xf32> to vector<8x32xf32>
    %c0_21 = arith.constant 0 : index
    %c0_22 = arith.constant 0 : index
    %51 = vector.load %arg12[%c0_21, %c0_22] : memref<8x32xf32, #tpu.memory_space<vmem>>, vector<8x32xf32>
    %52 = arith.mulf %48, %51 : vector<8x32xf32>
    %53 = arith.mulf %47, %49 : vector<8x32xf32>
    %54 = arith.addf %52, %53 : vector<8x32xf32>
    %55 = math.tanh %54 : vector<8x32xf32>
    %56 = arith.mulf %50, %55 : vector<8x32xf32>
    %c0_23 = arith.constant 0 : index
    %c0_24 = arith.constant 0 : index
    %57 = vector.load %arg9[%c0_23, %c0_24] : memref<8x32xf32, #tpu.memory_space<vmem>>, vector<8x32xf32>
    %58 = vector.shape_cast %6 : vector<8x1xi1> to vector<8x1xi1>
    %59 = vector.broadcast %58 : vector<8x1xi1> to vector<8x32xi1>
    %60 = arith.select %59, %32, %57 : vector<8x32xi1>, vector<8x32xf32>
    %c0_25 = arith.constant 0 : index
    %c0_26 = arith.constant 0 : index
    %61 = vector.load %arg10[%c0_25, %c0_26] : memref<8x32xf32, #tpu.memory_space<vmem>>, vector<8x32xf32>
    %62 = vector.shape_cast %6 : vector<8x1xi1> to vector<8x1xi1>
    %63 = vector.broadcast %62 : vector<8x1xi1> to vector<8x32xi1>
    %64 = arith.select %63, %30, %61 : vector<8x32xi1>, vector<8x32xf32>
    %c0_27 = arith.constant 0 : index
    %c0_28 = arith.constant 0 : index
    %65 = vector.load %arg11[%c0_27, %c0_28] : memref<8x32xf32, #tpu.memory_space<vmem>>, vector<8x32xf32>
    %66 = vector.shape_cast %8 : vector<8x1xi1> to vector<8x1xi1>
    %67 = vector.broadcast %66 : vector<8x1xi1> to vector<8x32xi1>
    %68 = arith.select %67, %56, %65 : vector<8x32xi1>, vector<8x32xf32>
    %c0_29 = arith.constant 0 : index
    %c0_30 = arith.constant 0 : index
    %69 = vector.load %arg12[%c0_29, %c0_30] : memref<8x32xf32, #tpu.memory_space<vmem>>, vector<8x32xf32>
    %70 = vector.shape_cast %8 : vector<8x1xi1> to vector<8x1xi1>
    %71 = vector.broadcast %70 : vector<8x1xi1> to vector<8x32xi1>
    %72 = arith.select %71, %54, %69 : vector<8x32xi1>, vector<8x32xf32>
    %c0_31 = arith.constant 0 : index
    %c0_32 = arith.constant 0 : index
    %73 = vector.load %arg9[%c0_31, %c0_32] : memref<8x32xf32, #tpu.memory_space<vmem>>, vector<8x32xf32>
    tpu.vector_store %arg9[%c0_31, %c0_32], %60 {strides = array<i32>} : memref<8x32xf32, #tpu.memory_space<vmem>>, vector<8x32xf32>,
    %c0_33 = arith.constant 0 : index
    %c0_34 = arith.constant 0 : index
    %74 = vector.load %arg10[%c0_33, %c0_34] : memref<8x32xf32, #tpu.memory_space<vmem>>, vector<8x32xf32>
    tpu.vector_store %arg10[%c0_33, %c0_34], %64 {strides = array<i32>} : memref<8x32xf32, #tpu.memory_space<vmem>>, vector<8x32xf32>,
    %c0_35 = arith.constant 0 : index
    %c0_36 = arith.constant 0 : index
    %75 = vector.load %arg11[%c0_35, %c0_36] : memref<8x32xf32, #tpu.memory_space<vmem>>, vector<8x32xf32>
    tpu.vector_store %arg11[%c0_35, %c0_36], %68 {strides = array<i32>} : memref<8x32xf32, #tpu.memory_space<vmem>>, vector<8x32xf32>,
    %c0_37 = arith.constant 0 : index
    %c0_38 = arith.constant 0 : index
    %76 = vector.load %arg12[%c0_37, %c0_38] : memref<8x32xf32, #tpu.memory_space<vmem>>, vector<8x32xf32>
    tpu.vector_store %arg12[%c0_37, %c0_38], %72 {strides = array<i32>} : memref<8x32xf32, #tpu.memory_space<vmem>>, vector<8x32xf32>,
    %c7_i32_39 = arith.constant 7 : i32
    %77 = arith.cmpi eq, %arg0, %c7_i32_39 : i32
    %78 = arith.extui %77 : i1 to i32
    %c0_i32_40 = arith.constant 0 : i32
    %79 = arith.cmpi ne, %78, %c0_i32_40 : i32
    scf.if %79 {
      %80 = tpu.concatenate %68, %60 in 1 : vector<8x32xf32>, vector<8x32xf32> -> vector<8x64xf32>
      %c0_41 = arith.constant 0 : index
      %c0_42 = arith.constant 0 : index
      %81 = vector.load %arg6[%c0_41, %c0_42] : memref<64x4xf32, #tpu.memory_space<vmem>>, vector<64x4xf32>
      %cst_43 = arith.constant dense<0.000000e+00> : vector<8x4xf32>
      %82 = tpu.matmul %80, %81, %cst_43 {dimension_numbers = #tpu.dot_dimension_numbers<[1], [0], [0], [1], [0, 0, 1, 1], [], []>} : vector<8x64xf32>, vector<64x4xf32>, vector<8x4xf32> -> vector<8x4xf32>
      %c0_44 = arith.constant 0 : index
      %c0_45 = arith.constant 0 : index
      %83 = vector.load %arg7[%c0_44, %c0_45] : memref<1x4xf32, #tpu.memory_space<vmem>>, vector<1x4xf32>
      %84 = vector.broadcast %83 : vector<1x4xf32> to vector<8x4xf32>
      %85 = arith.addf %82, %84 : vector<8x4xf32>
      %c0_46 = arith.constant 0 : index
      %c0_47 = arith.constant 0 : index
      %86 = vector.load %arg8[%c0_46, %c0_47] : memref<8x4xf32, #tpu.memory_space<vmem>>, vector<8x4xf32>
      tpu.vector_store %arg8[%c0_46, %c0_47], %85 {strides = array<i32>} : memref<8x4xf32, #tpu.memory_space<vmem>>, vector<8x4xf32>,
    } else {
    }
    return
  }
  func.func @transform_0(%arg0: i32) -> (i32, i32) {
    %c0_i32 = arith.constant 0 : i32
    %c0_i32_0 = arith.constant 0 : i32
    %c0_i32_1 = arith.constant 0 : i32
    return %c0_i32, %c0_i32_0 : i32, i32
  }
  func.func @transform_1(%arg0: i32) -> (i32, i32, i32) {
    %c0_i32 = arith.constant 0 : i32
    %c0_i32_0 = arith.constant 0 : i32
    %c0_i32_1 = arith.constant 0 : i32
    return %arg0, %c0_i32, %c0_i32_0 : i32, i32, i32
  }
  func.func @transform_2(%arg0: i32) -> (i32, i32, i32) {
    %c7_i32 = arith.constant 7 : i32
    %0 = arith.subi %c7_i32, %arg0 : i32
    %c0_i32 = arith.constant 0 : i32
    %c0_i32_0 = arith.constant 0 : i32
    %c0_i32_1 = arith.constant 0 : i32
    return %0, %c0_i32, %c0_i32_0 : i32, i32, i32
  }
  func.func @transform_3(%arg0: i32) -> (i32, i32) {
    %c0_i32 = arith.constant 0 : i32
    %c0_i32_0 = arith.constant 0 : i32
    %c0_i32_1 = arith.constant 0 : i32
    return %c0_i32, %c0_i32_0 : i32, i32
  }
  func.func @transform_4(%arg0: i32) -> (i32, i32) {
    %c0_i32 = arith.constant 0 : i32
    %c0_i32_0 = arith.constant 0 : i32
    %c0_i32_1 = arith.constant 0 : i32
    return %c0_i32, %c0_i32_0 : i32, i32
  }
  func.func @transform_5(%arg0: i32) -> (i32, i32) {
    %c0_i32 = arith.constant 0 : i32
    %c0_i32_0 = arith.constant 0 : i32
    %c0_i32_1 = arith.constant 0 : i32
    return %c0_i32, %c0_i32_0 : i32, i32
  }
  func.func @transform_6(%arg0: i32) -> (i32, i32) {
    %c0_i32 = arith.constant 0 : i32
    %c0_i32_0 = arith.constant 0 : i32
    %c0_i32_1 = arith.constant 0 : i32
    return %c0_i32, %c0_i32_0 : i32, i32
  }
  func.func @transform_7(%arg0: i32) -> (i32, i32) {
    %c0_i32 = arith.constant 0 : i32
    %c0_i32_0 = arith.constant 0 : i32
    %c0_i32_1 = arith.constant 0 : i32
    return %c0_i32, %c0_i32_0 : i32, i32
  }
}

module attributes {stable_mosaic.version = 11 : i64} {
  func.func @_bilstm_kernel(%arg0: i32, %arg1: memref<8x1xi32, #tpu.memory_space<vmem>>, %arg2: memref<1x8x128xbf16, #tpu.memory_space<vmem>>, %arg3: memref<1x8x128xbf16, #tpu.memory_space<vmem>>, %arg4: memref<32x128xbf16, #tpu.memory_space<vmem>>, %arg5: memref<32x128xbf16, #tpu.memory_space<vmem>>, %arg6: memref<1x8x32xbf16, #tpu.memory_space<vmem>>, %arg7: memref<1x8x32xbf16, #tpu.memory_space<vmem>>, %arg8: memref<8x32xf32, #tpu.memory_space<vmem>>, %arg9: memref<8x32xf32, #tpu.memory_space<vmem>>, %arg10: memref<8x32xf32, #tpu.memory_space<vmem>>, %arg11: memref<8x32xf32, #tpu.memory_space<vmem>>) attributes {dimension_semantics = [#tpu.dimension_semantics<arbitrary>], iteration_bounds = array<i64: 8>, scalar_prefetch = 0 : i64, scratch_operands = 4 : i64, tpu.core_type = #tpu.core_type<tc>, window_params = [{pipeline_mode = #tpu.pipeline_mode<synchronous>, transform_indices = @transform_0, window_bounds = array<i64: 8, 1>}, {transform_indices = @transform_1, window_bounds = array<i64: 1, 8, 128>}, {transform_indices = @transform_2, window_bounds = array<i64: 1, 8, 128>}, {pipeline_mode = #tpu.pipeline_mode<synchronous>, transform_indices = @transform_3, window_bounds = array<i64: 32, 128>}, {pipeline_mode = #tpu.pipeline_mode<synchronous>, transform_indices = @transform_4, window_bounds = array<i64: 32, 128>}, {transform_indices = @transform_5, window_bounds = array<i64: 1, 8, 32>}, {transform_indices = @transform_6, window_bounds = array<i64: 1, 8, 32>}]} {
    %c7_i32 = arith.constant 7 : i32
    %0 = arith.subi %c7_i32, %arg0 : i32
    %c0_i32 = arith.constant 0 : i32
    %1 = arith.cmpi eq, %arg0, %c0_i32 : i32
    %2 = arith.extui %1 : i1 to i32
    %c0_i32_0 = arith.constant 0 : i32
    %3 = arith.cmpi ne, %2, %c0_i32_0 : i32
    scf.if %3 {
      %cst_47 = arith.constant 0.000000e+00 : f32
      %93 = vector.broadcast %cst_47 : f32 to vector<8x32xf32>
      %c0_48 = arith.constant 0 : index
      %c0_49 = arith.constant 0 : index
      %94 = vector.load %arg8[%c0_48, %c0_49] : memref<8x32xf32, #tpu.memory_space<vmem>>, vector<8x32xf32>
      tpu.vector_store %arg8[%c0_48, %c0_49], %93 {strides = array<i32>} : memref<8x32xf32, #tpu.memory_space<vmem>>, vector<8x32xf32>,
      %cst_50 = arith.constant 0.000000e+00 : f32
      %95 = vector.broadcast %cst_50 : f32 to vector<8x32xf32>
      %c0_51 = arith.constant 0 : index
      %c0_52 = arith.constant 0 : index
      %96 = vector.load %arg9[%c0_51, %c0_52] : memref<8x32xf32, #tpu.memory_space<vmem>>, vector<8x32xf32>
      tpu.vector_store %arg9[%c0_51, %c0_52], %95 {strides = array<i32>} : memref<8x32xf32, #tpu.memory_space<vmem>>, vector<8x32xf32>,
      %cst_53 = arith.constant 0.000000e+00 : f32
      %97 = vector.broadcast %cst_53 : f32 to vector<8x32xf32>
      %c0_54 = arith.constant 0 : index
      %c0_55 = arith.constant 0 : index
      %98 = vector.load %arg10[%c0_54, %c0_55] : memref<8x32xf32, #tpu.memory_space<vmem>>, vector<8x32xf32>
      tpu.vector_store %arg10[%c0_54, %c0_55], %97 {strides = array<i32>} : memref<8x32xf32, #tpu.memory_space<vmem>>, vector<8x32xf32>,
      %cst_56 = arith.constant 0.000000e+00 : f32
      %99 = vector.broadcast %cst_56 : f32 to vector<8x32xf32>
      %c0_57 = arith.constant 0 : index
      %c0_58 = arith.constant 0 : index
      %100 = vector.load %arg11[%c0_57, %c0_58] : memref<8x32xf32, #tpu.memory_space<vmem>>, vector<8x32xf32>
      tpu.vector_store %arg11[%c0_57, %c0_58], %99 {strides = array<i32>} : memref<8x32xf32, #tpu.memory_space<vmem>>, vector<8x32xf32>,
    } else {
    }
    %c0 = arith.constant 0 : index
    %c0_1 = arith.constant 0 : index
    %4 = vector.load %arg1[%c0, %c0_1] : memref<8x1xi32, #tpu.memory_space<vmem>>, vector<8x1xi32>
    %5 = vector.broadcast %arg0 : i32 to vector<8x1xi32>
    %6 = arith.cmpi slt, %5, %4 : vector<8x1xi32>
    %7 = vector.broadcast %0 : i32 to vector<8x1xi32>
    %8 = arith.cmpi slt, %7, %4 : vector<8x1xi32>
    %c0_2 = arith.constant 0 : index
    %c0_3 = arith.constant 0 : index
    %c0_4 = arith.constant 0 : index
    %9 = vector.load %arg2[%c0_2, %c0_3, %c0_4] : memref<1x8x128xbf16, #tpu.memory_space<vmem>>, vector<1x8x128xbf16>
    %10 = vector.shape_cast %9 : vector<1x8x128xbf16> to vector<8x128xbf16>
    %11 = arith.extf %10 : vector<8x128xbf16> to vector<8x128xf32>
    %c0_5 = arith.constant 0 : index
    %c0_6 = arith.constant 0 : index
    %12 = vector.load %arg8[%c0_5, %c0_6] : memref<8x32xf32, #tpu.memory_space<vmem>>, vector<8x32xf32>
    %13 = arith.truncf %12 : vector<8x32xf32> to vector<8x32xbf16>
    %c0_7 = arith.constant 0 : index
    %c0_8 = arith.constant 0 : index
    %14 = vector.load %arg4[%c0_7, %c0_8] : memref<32x128xbf16, #tpu.memory_space<vmem>>, vector<32x128xbf16>
    %cst = arith.constant dense<0.000000e+00> : vector<8x128xf32>
    %15 = tpu.matmul %13, %14, %cst {dimension_numbers = #tpu.dot_dimension_numbers<[1], [0], [0], [1], [0, 0, 1, 1], [], []>} : vector<8x32xbf16>, vector<32x128xbf16>, vector<8x128xf32> -> vector<8x128xf32>
    %16 = arith.addf %11, %15 : vector<8x128xf32>
    %17 = arith.negf %16 : vector<8x128xf32>
    %18 = math.exp %17 : vector<8x128xf32>
    %cst_9 = arith.constant 1.000000e+00 : f32
    %19 = vector.broadcast %cst_9 : f32 to vector<8x128xf32>
    %20 = arith.addf %19, %18 : vector<8x128xf32>
    %21 = arith.divf %19, %20 : vector<8x128xf32>
    %22 = math.tanh %16 : vector<8x128xf32>
    %23 = vector.extract_strided_slice %21 {offsets = [0, 0], sizes = [8, 32], strides = [1, 1]} : vector<8x128xf32> to vector<8x32xf32>
    %24 = vector.extract_strided_slice %21 {offsets = [0, 32], sizes = [8, 32], strides = [1, 1]} : vector<8x128xf32> to vector<8x32xf32>
    %25 = vector.extract_strided_slice %22 {offsets = [0, 64], sizes = [8, 32], strides = [1, 1]} : vector<8x128xf32> to vector<8x32xf32>
    %26 = vector.extract_strided_slice %21 {offsets = [0, 96], sizes = [8, 32], strides = [1, 1]} : vector<8x128xf32> to vector<8x32xf32>
    %c0_10 = arith.constant 0 : index
    %c0_11 = arith.constant 0 : index
    %27 = vector.load %arg9[%c0_10, %c0_11] : memref<8x32xf32, #tpu.memory_space<vmem>>, vector<8x32xf32>
    %28 = arith.mulf %24, %27 : vector<8x32xf32>
    %29 = arith.mulf %23, %25 : vector<8x32xf32>
    %30 = arith.addf %28, %29 : vector<8x32xf32>
    %31 = math.tanh %30 : vector<8x32xf32>
    %32 = arith.mulf %26, %31 : vector<8x32xf32>
    %c0_12 = arith.constant 0 : index
    %c0_13 = arith.constant 0 : index
    %c0_14 = arith.constant 0 : index
    %33 = vector.load %arg3[%c0_12, %c0_13, %c0_14] : memref<1x8x128xbf16, #tpu.memory_space<vmem>>, vector<1x8x128xbf16>
    %34 = vector.shape_cast %33 : vector<1x8x128xbf16> to vector<8x128xbf16>
    %35 = arith.extf %34 : vector<8x128xbf16> to vector<8x128xf32>
    %c0_15 = arith.constant 0 : index
    %c0_16 = arith.constant 0 : index
    %36 = vector.load %arg10[%c0_15, %c0_16] : memref<8x32xf32, #tpu.memory_space<vmem>>, vector<8x32xf32>
    %37 = arith.truncf %36 : vector<8x32xf32> to vector<8x32xbf16>
    %c0_17 = arith.constant 0 : index
    %c0_18 = arith.constant 0 : index
    %38 = vector.load %arg5[%c0_17, %c0_18] : memref<32x128xbf16, #tpu.memory_space<vmem>>, vector<32x128xbf16>
    %cst_19 = arith.constant dense<0.000000e+00> : vector<8x128xf32>
    %39 = tpu.matmul %37, %38, %cst_19 {dimension_numbers = #tpu.dot_dimension_numbers<[1], [0], [0], [1], [0, 0, 1, 1], [], []>} : vector<8x32xbf16>, vector<32x128xbf16>, vector<8x128xf32> -> vector<8x128xf32>
    %40 = arith.addf %35, %39 : vector<8x128xf32>
    %41 = arith.negf %40 : vector<8x128xf32>
    %42 = math.exp %41 : vector<8x128xf32>
    %cst_20 = arith.constant 1.000000e+00 : f32
    %43 = vector.broadcast %cst_20 : f32 to vector<8x128xf32>
    %44 = arith.addf %43, %42 : vector<8x128xf32>
    %45 = arith.divf %43, %44 : vector<8x128xf32>
    %46 = math.tanh %40 : vector<8x128xf32>
    %47 = vector.extract_strided_slice %45 {offsets = [0, 0], sizes = [8, 32], strides = [1, 1]} : vector<8x128xf32> to vector<8x32xf32>
    %48 = vector.extract_strided_slice %45 {offsets = [0, 32], sizes = [8, 32], strides = [1, 1]} : vector<8x128xf32> to vector<8x32xf32>
    %49 = vector.extract_strided_slice %46 {offsets = [0, 64], sizes = [8, 32], strides = [1, 1]} : vector<8x128xf32> to vector<8x32xf32>
    %50 = vector.extract_strided_slice %45 {offsets = [0, 96], sizes = [8, 32], strides = [1, 1]} : vector<8x128xf32> to vector<8x32xf32>
    %c0_21 = arith.constant 0 : index
    %c0_22 = arith.constant 0 : index
    %51 = vector.load %arg11[%c0_21, %c0_22] : memref<8x32xf32, #tpu.memory_space<vmem>>, vector<8x32xf32>
    %52 = arith.mulf %48, %51 : vector<8x32xf32>
    %53 = arith.mulf %47, %49 : vector<8x32xf32>
    %54 = arith.addf %52, %53 : vector<8x32xf32>
    %55 = math.tanh %54 : vector<8x32xf32>
    %56 = arith.mulf %50, %55 : vector<8x32xf32>
    %c0_23 = arith.constant 0 : index
    %c0_24 = arith.constant 0 : index
    %57 = vector.load %arg8[%c0_23, %c0_24] : memref<8x32xf32, #tpu.memory_space<vmem>>, vector<8x32xf32>
    %58 = vector.shape_cast %6 : vector<8x1xi1> to vector<8x1xi1>
    %59 = vector.broadcast %58 : vector<8x1xi1> to vector<8x32xi1>
    %60 = arith.select %59, %32, %57 : vector<8x32xi1>, vector<8x32xf32>
    %c0_25 = arith.constant 0 : index
    %c0_26 = arith.constant 0 : index
    %61 = vector.load %arg9[%c0_25, %c0_26] : memref<8x32xf32, #tpu.memory_space<vmem>>, vector<8x32xf32>
    %62 = vector.shape_cast %6 : vector<8x1xi1> to vector<8x1xi1>
    %63 = vector.broadcast %62 : vector<8x1xi1> to vector<8x32xi1>
    %64 = arith.select %63, %30, %61 : vector<8x32xi1>, vector<8x32xf32>
    %c0_27 = arith.constant 0 : index
    %c0_28 = arith.constant 0 : index
    %65 = vector.load %arg10[%c0_27, %c0_28] : memref<8x32xf32, #tpu.memory_space<vmem>>, vector<8x32xf32>
    %66 = vector.shape_cast %8 : vector<8x1xi1> to vector<8x1xi1>
    %67 = vector.broadcast %66 : vector<8x1xi1> to vector<8x32xi1>
    %68 = arith.select %67, %56, %65 : vector<8x32xi1>, vector<8x32xf32>
    %c0_29 = arith.constant 0 : index
    %c0_30 = arith.constant 0 : index
    %69 = vector.load %arg11[%c0_29, %c0_30] : memref<8x32xf32, #tpu.memory_space<vmem>>, vector<8x32xf32>
    %70 = vector.shape_cast %8 : vector<8x1xi1> to vector<8x1xi1>
    %71 = vector.broadcast %70 : vector<8x1xi1> to vector<8x32xi1>
    %72 = arith.select %71, %54, %69 : vector<8x32xi1>, vector<8x32xf32>
    %c0_31 = arith.constant 0 : index
    %c0_32 = arith.constant 0 : index
    %73 = vector.load %arg8[%c0_31, %c0_32] : memref<8x32xf32, #tpu.memory_space<vmem>>, vector<8x32xf32>
    tpu.vector_store %arg8[%c0_31, %c0_32], %60 {strides = array<i32>} : memref<8x32xf32, #tpu.memory_space<vmem>>, vector<8x32xf32>,
    %c0_33 = arith.constant 0 : index
    %c0_34 = arith.constant 0 : index
    %74 = vector.load %arg9[%c0_33, %c0_34] : memref<8x32xf32, #tpu.memory_space<vmem>>, vector<8x32xf32>
    tpu.vector_store %arg9[%c0_33, %c0_34], %64 {strides = array<i32>} : memref<8x32xf32, #tpu.memory_space<vmem>>, vector<8x32xf32>,
    %c0_35 = arith.constant 0 : index
    %c0_36 = arith.constant 0 : index
    %75 = vector.load %arg10[%c0_35, %c0_36] : memref<8x32xf32, #tpu.memory_space<vmem>>, vector<8x32xf32>
    tpu.vector_store %arg10[%c0_35, %c0_36], %68 {strides = array<i32>} : memref<8x32xf32, #tpu.memory_space<vmem>>, vector<8x32xf32>,
    %c0_37 = arith.constant 0 : index
    %c0_38 = arith.constant 0 : index
    %76 = vector.load %arg11[%c0_37, %c0_38] : memref<8x32xf32, #tpu.memory_space<vmem>>, vector<8x32xf32>
    tpu.vector_store %arg11[%c0_37, %c0_38], %72 {strides = array<i32>} : memref<8x32xf32, #tpu.memory_space<vmem>>, vector<8x32xf32>,
    %cst_39 = arith.constant 0.000000e+00 : f32
    %77 = vector.shape_cast %6 : vector<8x1xi1> to vector<8x1xi1>
    %78 = vector.broadcast %77 : vector<8x1xi1> to vector<8x32xi1>
    %79 = vector.broadcast %cst_39 : f32 to vector<8x32xf32>
    %80 = arith.select %78, %60, %79 : vector<8x32xi1>, vector<8x32xf32>
    %81 = arith.truncf %80 : vector<8x32xf32> to vector<8x32xbf16>
    %c0_40 = arith.constant 0 : index
    %c0_41 = arith.constant 0 : index
    %c0_42 = arith.constant 0 : index
    %82 = vector.load %arg6[%c0_40, %c0_41, %c0_42] : memref<1x8x32xbf16, #tpu.memory_space<vmem>>, vector<1x8x32xbf16>
    %83 = vector.shape_cast %82 : vector<1x8x32xbf16> to vector<8x32xbf16>
    %84 = vector.shape_cast %81 : vector<8x32xbf16> to vector<1x8x32xbf16>
    tpu.vector_store %arg6[%c0_40, %c0_41, %c0_42], %84 {strides = array<i32>} : memref<1x8x32xbf16, #tpu.memory_space<vmem>>, vector<1x8x32xbf16>,
    %cst_43 = arith.constant 0.000000e+00 : f32
    %85 = vector.shape_cast %8 : vector<8x1xi1> to vector<8x1xi1>
    %86 = vector.broadcast %85 : vector<8x1xi1> to vector<8x32xi1>
    %87 = vector.broadcast %cst_43 : f32 to vector<8x32xf32>
    %88 = arith.select %86, %68, %87 : vector<8x32xi1>, vector<8x32xf32>
    %89 = arith.truncf %88 : vector<8x32xf32> to vector<8x32xbf16>
    %c0_44 = arith.constant 0 : index
    %c0_45 = arith.constant 0 : index
    %c0_46 = arith.constant 0 : index
    %90 = vector.load %arg7[%c0_44, %c0_45, %c0_46] : memref<1x8x32xbf16, #tpu.memory_space<vmem>>, vector<1x8x32xbf16>
    %91 = vector.shape_cast %90 : vector<1x8x32xbf16> to vector<8x32xbf16>
    %92 = vector.shape_cast %89 : vector<8x32xbf16> to vector<1x8x32xbf16>
    tpu.vector_store %arg7[%c0_44, %c0_45, %c0_46], %92 {strides = array<i32>} : memref<1x8x32xbf16, #tpu.memory_space<vmem>>, vector<1x8x32xbf16>,
    return
  }
  func.func @transform_0(%arg0: i32) -> (i32, i32) {
    %c0_i32 = arith.constant 0 : i32
    %c0_i32_0 = arith.constant 0 : i32
    %c0_i32_1 = arith.constant 0 : i32
    return %c0_i32, %c0_i32_0 : i32, i32
  }
  func.func @transform_1(%arg0: i32) -> (i32, i32, i32) {
    %c0_i32 = arith.constant 0 : i32
    %c0_i32_0 = arith.constant 0 : i32
    %c0_i32_1 = arith.constant 0 : i32
    return %arg0, %c0_i32, %c0_i32_0 : i32, i32, i32
  }
  func.func @transform_2(%arg0: i32) -> (i32, i32, i32) {
    %c7_i32 = arith.constant 7 : i32
    %0 = arith.subi %c7_i32, %arg0 : i32
    %c0_i32 = arith.constant 0 : i32
    %c0_i32_0 = arith.constant 0 : i32
    %c0_i32_1 = arith.constant 0 : i32
    return %0, %c0_i32, %c0_i32_0 : i32, i32, i32
  }
  func.func @transform_3(%arg0: i32) -> (i32, i32) {
    %c0_i32 = arith.constant 0 : i32
    %c0_i32_0 = arith.constant 0 : i32
    %c0_i32_1 = arith.constant 0 : i32
    return %c0_i32, %c0_i32_0 : i32, i32
  }
  func.func @transform_4(%arg0: i32) -> (i32, i32) {
    %c0_i32 = arith.constant 0 : i32
    %c0_i32_0 = arith.constant 0 : i32
    %c0_i32_1 = arith.constant 0 : i32
    return %c0_i32, %c0_i32_0 : i32, i32
  }
  func.func @transform_5(%arg0: i32) -> (i32, i32, i32) {
    %c0_i32 = arith.constant 0 : i32
    %c0_i32_0 = arith.constant 0 : i32
    %c0_i32_1 = arith.constant 0 : i32
    return %arg0, %c0_i32, %c0_i32_0 : i32, i32, i32
  }
  func.func @transform_6(%arg0: i32) -> (i32, i32, i32) {
    %c7_i32 = arith.constant 7 : i32
    %0 = arith.subi %c7_i32, %arg0 : i32
    %c0_i32 = arith.constant 0 : i32
    %c0_i32_0 = arith.constant 0 : i32
    %c0_i32_1 = arith.constant 0 : i32
    return %0, %c0_i32, %c0_i32_0 : i32, i32, i32
  }
}

</mosaic_0001>

<bundles_post_ra>
// kernel: lstm_classifier_forward.2
= control target key start
LH: loop header
LB: loop body
LE: loop exit
PB: predicated region body
PF: predicated region fallthrough
CT: control target
= control target key end

     0   :  { %s783_s21 = smov 0   ;;  %s876_s0 = inlined_call_operand.vmem [shape: s32[8,1], index: 0, kind: input, shape index: {}]   ;;  %s877_s1 = inlined_call_operand.vmem [shape: bf16[8,8,128], index: 1, kind: input, shape index: {}]   ;;  %s878_s2 = inlined_call_operand.vmem [shape: bf16[8,8,128], index: 2, kind: input, shape index: {}]   ;;  %s879_s3 = inlined_call_operand.vmem [shape: bf16[32,128], index: 3, kind: input, shape index: {}]   ;;  %s880_s4 = inlined_call_operand.vmem [shape: bf16[32,128], index: 4, kind: input, shape index: {}]   ;;  %s881_s5 = inlined_call_operand.vmem [shape: bf16[8,8,32], index: 5, kind: output, shape index: {0}]   ;;  %s882_s6 = inlined_call_operand.vmem [shape: bf16[8,8,32], index: 6, kind: output, shape index: {1}]  }
   0x1 LB: > { %s789_s22 = sadd.s32 4294967295, %s739_s21   ;;  %p654_p0 = scmp.ge.s32.totalorder %s739_s21, 1  ;;  %s739_s21 = sphi %s783_s21, %s17_s21  }
   0x2   : > { %p229_p1 = scmp.lt.s32.totalorder %s739_s21, 9 }
   0x4   : > { %p230_p2 = pnand %p654_p0, %p229_p1 }
   0x5   : > { %p267_p3 = scmp.lt.s32.totalorder (!%p230_p2), %s789_s22, 7  ;;  %s795_s23 = ssub.s32 (!%p230_p2), 7, %s789_s22 }
   0x6   : > { %233 = sbr.rel (%p230_p2) target bundleno = 731 (0x2db), region = 40  ;;  %p272_p4 = scmp.lt.s32.totalorder (!%p230_p2), %s795_s23, 7 }
   0x7   : > { %p659_p5 = scmp.ne.s32.totalorder (!%p230_p2), %s789_s22, 0 }
   0xb   : > { %s268_s24 = scalar_select %p267_p3, %s789_s22, 7 }
   0xc   : > { %s273_s25 = scalar_select %p272_p4, %s795_s23, 7 }
   0xd   : > { %s655_s26 = sshll.u32 %s268_s24, 2  ;;  %292 = sbr.rel (%p659_p5) target bundleno = 21 (0x15), region = 44 }
   0xe   : > { %s803_s29 = scalar_lea.vmem %s877_s1, %s655_s26  ;;  %s656_s30 = sshll.u32 %s273_s25, 2 }
   0xf   : > { %s808_s9 = scalar_lea.vmem %s878_s2, %s656_s30  ;;  %s813_s12 = scalar_lea.vmem %s881_s5, %s655_s26 }
  0x10   : > { %s818_s15 = scalar_lea.vmem %s882_s6, %s656_s30 }
  0x12   : > { %vm293_vm0 = vcmask 261120   ;;  %v741_v0 = vmov 0.0  }
  0x13   : > { %294 = vst.msk [vmem:[#allocation2] sm:$0xff] %vm293_vm0, %v741_v0  ;;  %295 = vst.msk [vmem:[#allocation3] sm:$0xff] %vm293_vm0, %v741_v0 }
  0x14   : > { %296 = vst.msk [vmem:[#allocation4] sm:$0xff] %vm293_vm0, %v741_v0  ;;  %297 = vst.msk [vmem:[#allocation5] sm:$0xff] %vm293_vm0, %v741_v0 }
  0x15 PF: > { %v713_v1 = vld [vmem:[%s879_s3 + $0x8] sm:$0xff]   ;;  %v742_v2 = vmov 0.0   ;;  %v715_v4 = vld [vmem:[%s879_s3] sm:$0xff]   ;;  %vm743_vm1 = vmmov 0   ;;  %s744_s27 = smov 32   ;;  %vm323_vm2 = vcmask 261120   ;;  %v299_v36 = vstv %s789_s22 }
  0x16   : > { %680 = vmatprep.subr.bf16.mxu0 %v742_v2  ;;  %688 = vmatprep.subr.bf16.mxu1 %v742_v2  ;;  %v714_v3 = vld [vmem:[%s880_s4 + $0x8] sm:$0xff]   ;;  %v716_v5 = vld [vmem:[%s880_s4] sm:$0xff]   ;;  %v745_v26 = vmov 0   ;;  %s746_s28 = smov 64   ;;  %v301_v40 = vstv %s795_s23  ;;  %s747_s22 = smov 96   ;;  %vm540_vm7 = vcmask 257024  }
  0x17   : > { %681 = vmatpush3.bf16.msra.mxu0 %v713_v1  ;;  %684 = vmatprep.mubr.msk.bf16.mxu0 %vm743_vm1, %v742_v2  ;;  %v303_v12 = vld [vmem:[%s803_s29] sm:$0xf] }
  0x18   : > { %689 = vmatpush3.bf16.msra.mxu1 %v714_v3  ;;  %682 = vmatprep.subr.bf16.mxu0 %v742_v2  ;;  %v397_v13 = vld [vmem:[%s808_s9] sm:$0xf]  ;;  %v304_v14 = vunpack.c.l.bf16 %v303_v12 }
  0x19   : > { %690 = vmatprep.subr.bf16.mxu1 %v742_v2  ;;  %692 = vmatprep.mubr.msk.bf16.mxu1 %vm743_vm1, %v742_v2  ;;  %v398_v15 = vunpack.c.l.bf16 %v397_v13  ;;  %v298_v35 = vld [vmem:[%s876_s0] sm:$0xff] }
  0x1a   : > { %v833_v6 = vld [vmem:[#allocation2] sm:$0xff]  ;;  %v375_v8 = vld [vmem:[#allocation3] sm:$0xff]  ;;  %711 = vset.pattern.permute.xlu0 %v745_v26  ;;  %712 = vset.pattern.permute.xlu1 %v745_v26  ;;  %vm300_vm3 = vcmp.lt.s32.totalorder %v299_v36, %v298_v35  ;;  %vm302_vm4 = vcmp.lt.s32.totalorder %v301_v40, %v298_v35 }
  0x1b   : > { %v835_v7 = vld [vmem:[#allocation4] sm:$0xff]  ;;  %v306_v9 = vpack.c.bf16 %v833_v6, %v833_v6  ;;  %377 = vrot.lane.b32.xlu1 %v375_v8, %s744_s27  ;;  %683 = vmatpush3.bf16.msra.mxu0 %v715_v4  ;;  %v468_v11 = vld [vmem:[#allocation5] sm:$0xff]  ;;  %v490_v43 = vsel %vm300_vm3, 1, %v745_v26  ;;  %v501_v45 = vsel %vm302_vm4, 1, %v745_v26 }
  0x1c   : > { %v400_v10 = vpack.c.bf16 %v835_v7, %v835_v7  ;;  %691 = vmatpush3.bf16.msra.mxu1 %v716_v5 }
  0x1e   : > { %685 = vmatmul.mubr.msk.bf16.vlgmr.msra.gmra.mxu0 %vm323_vm2, %v306_v9 }
  0x1f   : > { %470 = vrot.lane.b32.xlu1 %v468_v11, %s744_s27  ;;  %693 = vmatmul.mubr.msk.bf16.vlgmr.msra.gmra.mxu1 %vm323_vm2, %v400_v10 }
  0x8d   : > { %v378_v46 = vpop.permute.xlu1 %377 }
  0x91   : > { %v471_v48 = vpop.permute.xlu1 %470 }
  0xde   : > { %v361_v16 = vpop.f32.mrf.mxu0 }
  0xdf   : > { %v367_v17 = vadd.f32 %v361_v16, %v304_v14  ;;  %v454_v18 = vpop.f32.mrf.mxu1 }
  0xe0   : > { %v460_v19 = vadd.f32 %v454_v18, %v398_v15  ;;  %v686_v20 = vpop.f32.mrf.mxu0 }
  0xe1   : > { %717 = vtanh.f32 %v367_v17  ;;  %v694_v21 = vpop.f32.mrf.mxu1  ;;  %v663_v29 = vmul.f32 -1.442695, %v367_v17 }
  0xe2   : > { %v364_v22 = vpop.f32.mrf.mxu0  ;;  %719 = vtanh.f32 %v460_v19  ;;  %v667_v30 = vmul.f32 -1.442695, %v460_v19 }
  0xe3   : > { %v457_v23 = vpop.f32.mrf.mxu1  ;;  %721 = vpow2.f32 %v663_v29 }
  0xe4   : > { %v687_v24 = vpop.f32.mrf.mxu0  ;;  %723 = vpow2.f32 %v667_v30 }
  0xe5   : > { %v695_v25 = vpop.f32.mrf.mxu1 }
  0xee   : > { %v718_v27 = vpop.eup %717 }
  0xef   : > { %382 = vrot.lane.b32.xlu0 %v718_v27, %s746_s28  ;;  %v720_v28 = vpop.eup %719 }
  0xf0   : > { %v722_v31 = vpop.eup %721 }
  0xf1   : > { %v371_v32 = vadd.f32 1.0, %v722_v31  ;;  %v724_v33 = vpop.eup %723 }
  0xf2   : > { %v464_v34 = vadd.f32 1.0, %v724_v33 }
  0xf3   : > { %475 = vrot.lane.b32.xlu0 %v720_v28, %s746_s28  ;;  %725 = vrcp.f32 %v371_v32 }
  0xf4   : > { %727 = vrcp.f32 %v464_v34 }
 0x100   : > { %v726_v37 = vpop.eup %725 }
 0x101   : > { %v728_v41 = vpop.eup %727  ;;  %v380_v47 = vmul.f32 %v726_v37, %v378_v46 }
 0x102   : > { %v473_v51 = vmul.f32 %v728_v41, %v471_v48 }
 0x161   : > { %v383_v38 = vpop.permute.xlu0 %382 }
 0x162   : > { %v385_v39 = vmul.f32 %v726_v37, %v383_v38 }
 0x164   : > { %387 = vrot.lane.b32.xlu0 %v385_v39, %s744_s27 }
 0x165   : > { %v476_v42 = vpop.permute.xlu0 %475 }
 0x166   : > { %v478_v44 = vmul.f32 %v728_v41, %v476_v42 }
 0x168   : > { %480 = vrot.lane.b32.xlu1 %v478_v44, %s744_s27  ;;  %492 = vperm.xlu0 %711, %v490_v43  }
 0x16c   : > { %503 = vperm.xlu1 %712, %v501_v45  }
 0x1d6   : > { %v388_v49 = vpop.permute.xlu0 %387 }
 0x1d7   : > { %v390_v50 = vadd.f32 %v388_v49, %v380_v47 }
 0x1d9   : > { %729 = vtanh.f32 %v390_v50 }
 0x1da   : > { %v481_v52 = vpop.permute.xlu1 %480 }
 0x1db   : > { %v483_v53 = vadd.f32 %v481_v52, %v473_v51 }
 0x1dd   : > { %731 = vtanh.f32 %v483_v53 }
 0x1e3   : > { %v493_v56 = vpop.permute.xlu0 %492 }
 0x1e4   : > { %vm494_vm5 = vcmp.eq.s32.totalorder %v493_v56, 1 }
 0x1e5   : > { %v500_v58 = vsel %vm494_vm5, %v390_v50, %v378_v46 }
 0x1e6   : > { %v730_v54 = vpop.eup %729 }
 0x1e7   : > { %393 = vrot.lane.b32.xlu1 %v730_v54, %s746_s28  ;;  %v504_v57 = vpop.permute.xlu1 %503 }
 0x1e8   : > { %vm505_vm6 = vcmp.eq.s32.totalorder %v504_v57, 1 }
 0x1e9   : > { %v511_v59 = vsel %vm505_vm6, %v483_v53, %v471_v48 }
 0x1ea   : > { %v732_v55 = vpop.eup %731 }
 0x1eb   : > { %496 = vrot.lane.b32.xlu1 %v833_v6, %s747_s22  ;;  %486 = vrot.lane.b32.xlu0 %v732_v55, %s746_s28 }
 0x1ef   : > { %507 = vrot.lane.b32.xlu0 %v835_v7, %s747_s22 }
 0x1f3   : > { %518 = vrot.lane.b32.xlu0 %v500_v58, %s747_s22 }
 0x1f7   : > { %528 = vrot.lane.b32.xlu0 %v511_v59, %s747_s22 }
 0x259   : > { %v394_v60 = vpop.permute.xlu1 %393 }
 0x25a   : > { %v396_v61 = vmul.f32 %v726_v37, %v394_v60 }
 0x25c   : > { %v532_v5 = vsel %vm494_vm5, %v396_v61, 0.0 }
 0x25d   : > { %v497_v62 = vpop.permute.xlu1 %496  ;;  %v487_v63 = vpop.permute.xlu0 %486  ;;  %v672_v7 = vpack.c.bf16 %v532_v5, %v532_v5 }
 0x25e   : > { %v489_v0 = vmul.f32 %v728_v41, %v487_v63  ;;  %v499_v1 = vsel %vm494_vm5, %v396_v61, %v497_v62 }
 0x25f   : > { %513 = vrot.lane.b32.xlu1 %v499_v1, %s744_s27 }
 0x260   : > { %v542_v2 = vsel %vm505_vm6, %v489_v0, 0.0 }
 0x261   : > { %v673_v3 = vpack.c.bf16 %v542_v2, %v542_v2  ;;  %v508_v4 = vpop.permute.xlu0 %507 }
 0x262   : > { %v510_v6 = vsel %vm505_vm6, %v489_v0, %v508_v4 }
 0x263   : > { %547 = vrot.lane.b32.xlu0 %v673_v3, %s744_s27  ;;  %523 = vrot.lane.b32.xlu1 %v510_v6, %s744_s27 }
 0x265   : > { %v519_v8 = vpop.permute.xlu0 %518 }
 0x266   : > { %521 = vst.msk [vmem:[#allocation3] sm:$0xff] %vm323_vm2, %v519_v8 }
 0x267   : > { %537 = vrot.lane.b32.xlu1 %v672_v7, %s744_s27 }
 0x269   : > { %v529_v9 = vpop.permute.xlu0 %528 }
 0x26a   : > { %531 = vst.msk [vmem:[#allocation5] sm:$0xff] %vm323_vm2, %v529_v9 }
 0x2d1   : > { %v514_v10 = vpop.permute.xlu1 %513 }
 0x2d2   : > { %516 = vst.msk [vmem:[#allocation2] sm:$0xff] %vm323_vm2, %v514_v10 }
 0x2d5   : > { %v524_v11 = vpop.permute.xlu1 %523  ;;  %v548_v12 = vpop.permute.xlu0 %547 }
 0x2d6   : > { %526 = vst.msk [vmem:[#allocation4] sm:$0xff] %vm323_vm2, %v524_v11 }
 0x2d7   : > { %550 = vst.msk [vmem:[%s818_s15] sm:$0xf] %vm540_vm7, %v548_v12 }
 0x2d9   : > { %v538_v13 = vpop.permute.xlu1 %537 }
 0x2da   : > { %541 = vst.msk [vmem:[%s813_s12] sm:$0xf] %vm540_vm7, %v538_v13 }
 0x2db PF: > { %s17_s21 = sadd.s32 1, %s739_s21  }
 0x2dc   : > { %p14_p6 = scmp.ge.s32.totalorder %s17_s21, 10  }
 0x2de   :  { %16 = sbr.rel (!%p14_p6) target bundleno = 1 (0x1), region = 89 }

// kernel: lstm_classifier_forward.3
= control target key start
LH: loop header
LB: loop body
LE: loop exit
PB: predicated region body
PF: predicated region fallthrough
CT: control target
= control target key end

     0   :  { %s837_s24 = smov 0   ;;  %s945_s0 = inlined_call_operand.vmem [shape: s32[8,1], index: 0, kind: input, shape index: {}]   ;;  %s946_s1 = inlined_call_operand.vmem [shape: bf16[8,8,128], index: 1, kind: input, shape index: {}]   ;;  %s947_s2 = inlined_call_operand.vmem [shape: bf16[8,8,128], index: 2, kind: input, shape index: {}]   ;;  %s948_s3 = inlined_call_operand.vmem [shape: bf16[32,128], index: 3, kind: input, shape index: {}]   ;;  %s949_s4 = inlined_call_operand.vmem [shape: bf16[32,128], index: 4, kind: input, shape index: {}]   ;;  %s950_s5 = inlined_call_operand.vmem [shape: f32[64,4], index: 5, kind: input, shape index: {}]   ;;  %s951_s6 = inlined_call_operand.vmem [shape: f32[1,4], index: 6, kind: input, shape index: {}]   ;;  %s952_s7 = inlined_call_operand.vmem [shape: f32[8,4], index: 7, kind: output, shape index: {}]  }
   0x1 LB: > { %s843_s25 = sadd.s32 4294967295, %s785_s24   ;;  %p672_p0 = scmp.ge.s32.totalorder %s785_s24, 1  ;;  %s785_s24 = sphi %s837_s24, %s17_s24  }
   0x2   : > { %p244_p1 = scmp.lt.s32.totalorder %s785_s24, 9 }
   0x4   : > { %p245_p2 = pnand %p672_p0, %p244_p1 }
   0x5   : > { %p275_p3 = scmp.lt.s32.totalorder (!%p245_p2), %s843_s25, 7  ;;  %s849_s26 = ssub.s32 (!%p245_p2), 7, %s843_s25 }
   0x6   : > { %248 = sbr.rel (%p245_p2) target bundleno = 1039 (0x40f), region = 48  ;;  %p280_p4 = scmp.lt.s32.totalorder (!%p245_p2), %s849_s26, 7 }
   0x7   : > { %p675_p5 = scmp.ne.s32.totalorder (!%p245_p2), %s843_s25, 0 }
   0xb   : > { %s276_s27 = scalar_select %p275_p3, %s843_s25, 7 }
   0xc   : > { %s281_s28 = scalar_select %p280_p4, %s849_s26, 7 }
   0xd   : > { %s673_s29 = sshll.u32 %s276_s27, 2  ;;  %290 = sbr.rel (%p675_p5) target bundleno = 21 (0x15), region = 52 }
   0xe   : > { %s857_s9 = scalar_lea.vmem %s946_s1, %s673_s29  ;;  %s674_s10 = sshll.u32 %s281_s28, 2 }
   0xf   : > { %s862_s13 = scalar_lea.vmem %s947_s2, %s674_s10 }
  0x12   : > { %vm291_vm0 = vcmask 261120   ;;  %v787_v0 = vmov 0.0  }
  0x13   : > { %292 = vst.msk [vmem:[#allocation2] sm:$0xff] %vm291_vm0, %v787_v0  ;;  %293 = vst.msk [vmem:[#allocation3] sm:$0xff] %vm291_vm0, %v787_v0 }
  0x14   : > { %294 = vst.msk [vmem:[#allocation4] sm:$0xff] %vm291_vm0, %v787_v0  ;;  %295 = vst.msk [vmem:[#allocation5] sm:$0xff] %vm291_vm0, %v787_v0 }
  0x15 PF: > { %v759_v1 = vld [vmem:[%s948_s3 + $0x8] sm:$0xff]   ;;  %v788_v2 = vmov 0.0   ;;  %v761_v4 = vld [vmem:[%s948_s3] sm:$0xff]   ;;  %vm789_vm1 = vmmov 0   ;;  %s790_s22 = smov 32   ;;  %vm321_vm2 = vcmask 261120   ;;  %v297_v36 = vstv %s843_s25 }
  0x16   : > { %704 = vmatprep.subr.bf16.mxu0 %v788_v2  ;;  %712 = vmatprep.subr.bf16.mxu1 %v788_v2  ;;  %v760_v3 = vld [vmem:[%s949_s4 + $0x8] sm:$0xff]   ;;  %v762_v5 = vld [vmem:[%s949_s4] sm:$0xff]   ;;  %v791_v26 = vmov 0   ;;  %s792_s23 = smov 64   ;;  %v299_v40 = vstv %s849_s26  ;;  %s793_s26 = smov 96  }
  0x17   : > { %705 = vmatpush3.bf16.msra.mxu0 %v759_v1  ;;  %708 = vmatprep.mubr.msk.bf16.mxu0 %vm789_vm1, %v788_v2  ;;  %v301_v12 = vld [vmem:[%s857_s9] sm:$0xf]  ;;  %p684_p6 = scmp.ne.s32.totalorder %s843_s25, 7 }
  0x18   : > { %713 = vmatpush3.bf16.msra.mxu1 %v760_v3  ;;  %706 = vmatprep.subr.bf16.mxu0 %v788_v2  ;;  %v395_v13 = vld [vmem:[%s862_s13] sm:$0xf]  ;;  %v302_v14 = vunpack.c.l.bf16 %v301_v12  ;;  %s794_s8 = smov (!%p684_p6), 64  }
  0x19   : > { %714 = vmatprep.subr.bf16.mxu1 %v788_v2  ;;  %716 = vmatprep.mubr.msk.bf16.mxu1 %vm789_vm1, %v788_v2  ;;  %v396_v15 = vunpack.c.l.bf16 %v395_v13  ;;  %v296_v35 = vld [vmem:[%s945_s0] sm:$0xff] }
  0x1a   : > { %v877_v6 = vld [vmem:[#allocation2] sm:$0xff]  ;;  %v373_v8 = vld [vmem:[#allocation3] sm:$0xff]  ;;  %757 = vset.pattern.permute.xlu0 %v791_v26  ;;  %758 = vset.pattern.permute.xlu1 %v791_v26  ;;  %vm298_vm3 = vcmp.lt.s32.totalorder %v297_v36, %v296_v35  ;;  %vm300_vm4 = vcmp.lt.s32.totalorder %v299_v40, %v296_v35 }
  0x1b   : > { %v879_v7 = vld [vmem:[#allocation4] sm:$0xff]  ;;  %v304_v9 = vpack.c.bf16 %v877_v6, %v877_v6  ;;  %375 = vrot.lane.b32.xlu1 %v373_v8, %s790_s22  ;;  %707 = vmatpush3.bf16.msra.mxu0 %v761_v4  ;;  %v466_v11 = vld [vmem:[#allocation5] sm:$0xff]  ;;  %v488_v43 = vsel %vm298_vm3, 1, %v791_v26  ;;  %v499_v45 = vsel %vm300_vm4, 1, %v791_v26 }
  0x1c   : > { %v398_v10 = vpack.c.bf16 %v879_v7, %v879_v7  ;;  %715 = vmatpush3.bf16.msra.mxu1 %v762_v5 }
  0x1e   : > { %709 = vmatmul.mubr.msk.bf16.vlgmr.msra.gmra.mxu0 %vm321_vm2, %v304_v9 }
  0x1f   : > { %468 = vrot.lane.b32.xlu1 %v466_v11, %s790_s22  ;;  %717 = vmatmul.mubr.msk.bf16.vlgmr.msra.gmra.mxu1 %vm321_vm2, %v398_v10 }
  0x8d   : > { %v376_v46 = vpop.permute.xlu1 %375 }
  0x91   : > { %v469_v48 = vpop.permute.xlu1 %468 }
  0xde   : > { %v359_v16 = vpop.f32.mrf.mxu0 }
  0xdf   : > { %v365_v17 = vadd.f32 %v359_v16, %v302_v14  ;;  %v452_v18 = vpop.f32.mrf.mxu1 }
  0xe0   : > { %v458_v19 = vadd.f32 %v452_v18, %v396_v15  ;;  %v710_v20 = vpop.f32.mrf.mxu0 }
  0xe1   : > { %763 = vtanh.f32 %v365_v17  ;;  %v718_v21 = vpop.f32.mrf.mxu1  ;;  %v679_v29 = vmul.f32 -1.442695, %v365_v17 }
  0xe2   : > { %v362_v22 = vpop.f32.mrf.mxu0  ;;  %765 = vtanh.f32 %v458_v19  ;;  %v683_v30 = vmul.f32 -1.442695, %v458_v19 }
  0xe3   : > { %v455_v23 = vpop.f32.mrf.mxu1  ;;  %767 = vpow2.f32 %v679_v29 }
  0xe4   : > { %v711_v24 = vpop.f32.mrf.mxu0  ;;  %769 = vpow2.f32 %v683_v30 }
  0xe5   : > { %v719_v25 = vpop.f32.mrf.mxu1 }
  0xee   : > { %v764_v27 = vpop.eup %763 }
  0xef   : > { %380 = vrot.lane.b32.xlu0 %v764_v27, %s792_s23  ;;  %v766_v28 = vpop.eup %765 }
  0xf0   : > { %v768_v31 = vpop.eup %767 }
  0xf1   : > { %v369_v32 = vadd.f32 1.0, %v768_v31  ;;  %v770_v33 = vpop.eup %769 }
  0xf2   : > { %v462_v34 = vadd.f32 1.0, %v770_v33 }
  0xf3   : > { %473 = vrot.lane.b32.xlu0 %v766_v28, %s792_s23  ;;  %771 = vrcp.f32 %v369_v32 }
  0xf4   : > { %773 = vrcp.f32 %v462_v34 }
 0x100   : > { %v772_v37 = vpop.eup %771 }
 0x101   : > { %v774_v41 = vpop.eup %773  ;;  %v378_v47 = vmul.f32 %v772_v37, %v376_v46 }
 0x102   : > { %v471_v51 = vmul.f32 %v774_v41, %v469_v48 }
 0x161   : > { %v381_v38 = vpop.permute.xlu0 %380 }
 0x162   : > { %v383_v39 = vmul.f32 %v772_v37, %v381_v38 }
 0x164   : > { %385 = vrot.lane.b32.xlu0 %v383_v39, %s790_s22 }
 0x165   : > { %v474_v42 = vpop.permute.xlu0 %473 }
 0x166   : > { %v476_v44 = vmul.f32 %v774_v41, %v474_v42 }
 0x168   : > { %478 = vrot.lane.b32.xlu1 %v476_v44, %s790_s22  ;;  %490 = vperm.xlu0 %757, %v488_v43  }
 0x16c   : > { %501 = vperm.xlu1 %758, %v499_v45  }
 0x1d6   : > { %v386_v49 = vpop.permute.xlu0 %385 }
 0x1d7   : > { %v388_v50 = vadd.f32 %v386_v49, %v378_v47 }
 0x1d9   : > { %775 = vtanh.f32 %v388_v50 }
 0x1da   : > { %v479_v52 = vpop.permute.xlu1 %478 }
 0x1db   : > { %v481_v53 = vadd.f32 %v479_v52, %v471_v51 }
 0x1dd   : > { %777 = vtanh.f32 %v481_v53 }
 0x1e3   : > { %v491_v56 = vpop.permute.xlu0 %490 }
 0x1e4   : > { %vm492_vm5 = vcmp.eq.s32.totalorder %v491_v56, 1 }
 0x1e5   : > { %v498_v58 = vsel %vm492_vm5, %v388_v50, %v376_v46 }
 0x1e6   : > { %v776_v54 = vpop.eup %775 }
 0x1e7   : > { %391 = vrot.lane.b32.xlu1 %v776_v54, %s792_s23  ;;  %v502_v57 = vpop.permute.xlu1 %501 }
 0x1e8   : > { %vm503_vm6 = vcmp.eq.s32.totalorder %v502_v57, 1 }
 0x1e9   : > { %v509_v59 = vsel %vm503_vm6, %v481_v53, %v469_v48 }
 0x1ea   : > { %v778_v55 = vpop.eup %777 }
 0x1eb   : > { %494 = vrot.lane.b32.xlu1 %v877_v6, %s793_s26  ;;  %484 = vrot.lane.b32.xlu0 %v778_v55, %s792_s23 }
 0x1ef   : > { %505 = vrot.lane.b32.xlu0 %v879_v7, %s793_s26 }
 0x1f3   : > { %516 = vrot.lane.b32.xlu0 %v498_v58, %s793_s26 }
 0x1f7   : > { %526 = vrot.lane.b32.xlu0 %v509_v59, %s793_s26 }
 0x259   : > { %v392_v60 = vpop.permute.xlu1 %391 }
 0x25a   : > { %v394_v61 = vmul.f32 %v772_v37, %v392_v60 }
 0x25d   : > { %v495_v62 = vpop.permute.xlu1 %494  ;;  %v485_v63 = vpop.permute.xlu0 %484 }
 0x25e   : > { %v497_v0 = vsel %vm492_vm5, %v394_v61, %v495_v62  ;;  %v487_v1 = vmul.f32 %v774_v41, %v485_v63 }
 0x25f   : > { %511 = vrot.lane.b32.xlu1 %v497_v0, %s790_s22 }
 0x261   : > { %v506_v2 = vpop.permute.xlu0 %505 }
 0x262   : > { %v508_v3 = vsel %vm503_vm6, %v487_v1, %v506_v2 }
 0x263   : > { %521 = vrot.lane.b32.xlu1 %v508_v3, %s790_s22 }
 0x265   : > { %v517_v4 = vpop.permute.xlu0 %516 }
 0x266   : > { %519 = vst.msk [vmem:[#allocation3] sm:$0xff] %vm321_vm2, %v517_v4 }
 0x269   : > { %v527_v5 = vpop.permute.xlu0 %526 }
 0x26a   : > { %529 = vst.msk [vmem:[#allocation5] sm:$0xff] %vm321_vm2, %v527_v5 }
 0x2d1   : > { %v512_v6 = vpop.permute.xlu1 %511 }
 0x2d2   : > { %514 = vst.msk [vmem:[#allocation2] sm:$0xff] %vm321_vm2, %v512_v6  ;;  %533 = sbr.rel (%p684_p6) target bundleno = 1039 (0x40f), region = 56 }
 0x2d5   : > { %v522_v7 = vpop.permute.xlu1 %521 }
 0x2d6   : > { %524 = vst.msk [vmem:[#allocation4] sm:$0xff] %vm321_vm2, %v522_v7 }
 0x2d7   : > { %v545_v8 = vld [vmem:[%s950_s5 + $0x38] sm:$0xff]  ;;  %534 = vrot.lane.b32.xlu0 %v497_v0, %s794_s8  ;;  %v795_v9 = vmov 0.0   ;;  %v544_v10 = vld [vmem:[%s950_s5 + $0x30] sm:$0xff]  ;;  %vm796_vm7 = vmmov 0   ;;  %v543_v11 = vld [vmem:[%s950_s5 + $0x28] sm:$0xff]  ;;  %vm553_vm8 = vcmask 523264  }
 0x2d8   : > { %720 = vmatprep.subr.mxu0 %v795_v9  ;;  %736 = vmatprep.mubr.msk.f32.mxu0 %vm796_vm7, %v795_v9  ;;  %v542_v12 = vld [vmem:[%s950_s5 + $0x20] sm:$0xff]  ;;  %v541_v13 = vld [vmem:[%s950_s5 + $0x18] sm:$0xff]  ;;  %v540_v14 = vld [vmem:[%s950_s5 + $0x10] sm:$0xff]  ;;  %vm627_vm9 = vcmask 31744  }
 0x2d9   : > { %721 = vmatpush3.msra.mxu0 %v545_v8  ;;  %v539_v15 = vld [vmem:[%s950_s5 + $0x8] sm:$0xff]  ;;  %v538_v16 = vld [vmem:[%s950_s5] sm:$0xff] }
 0x2da   : > { %722 = vmatprep.subr.mxu0 %v795_v9  ;;  %v685_v19 = vld [vmem:[%s951_s6] ss:$0 sm:$0xff] }
 0x2db   : > { %723 = vmatpush3.msra.mxu0 %v544_v10 }
 0x2dc   : > { %724 = vmatprep.subr.mxu0 %v795_v9 }
 0x2dd   : > { %725 = vmatpush3.msra.mxu0 %v543_v11 }
 0x2de   : > { %726 = vmatprep.subr.mxu0 %v795_v9 }
 0x2df   : > { %727 = vmatpush3.msra.mxu0 %v542_v12 }
 0x2e0   : > { %728 = vmatprep.subr.mxu0 %v795_v9 }
 0x2e1   : > { %729 = vmatpush3.msra.mxu0 %v541_v13 }
 0x2e2   : > { %730 = vmatprep.subr.mxu0 %v795_v9 }
 0x2e3   : > { %731 = vmatpush3.msra.mxu0 %v540_v14 }
 0x2e4   : > { %732 = vmatprep.subr.mxu0 %v795_v9 }
 0x2e5   : > { %733 = vmatpush3.msra.mxu0 %v539_v15 }
 0x2e6   : > { %734 = vmatprep.subr.mxu0 %v795_v9 }
 0x2e7   : > { %735 = vmatpush3.msra.mxu0 %v538_v16 }
 0x349   : > { %v535_v17 = vpop.permute.xlu0 %534 }
 0x34a   : > { %v537_v18 = vsel %vm321_vm2, %v522_v7, %v535_v17 }
 0x34b   : > { %737 = vmatmul.mubr.msk.f32.vlgmr.msra.gmra.mxu0 %vm553_vm8, %v537_v18 }
 0x40b   : > { %v623_v20 = vpop.f32.mrf.mxu0 }
 0x40c   : > { %v624_v21 = vadd.f32 %v685_v19, %v623_v20 }
 0x40d   : > { %v738_v22 = vpop.f32.mrf.mxu0 }
 0x40e   : > { %628 = vst.msk [vmem:[%s952_s7] sm:$0xff] %vm627_vm9, %v624_v21 }
 0x40f PF: > { %s17_s24 = sadd.s32 1, %s785_s24  }
 0x410   : > { %p14_p7 = scmp.ge.s32.totalorder %s17_s24, 10  }
 0x412   :  { %16 = sbr.rel (!%p14_p7) target bundleno = 1 (0x1), region = 85 }

</bundles_post_ra>
